<compile_context>
chip_gen: v5e
topology: v5e:2x2
jax: 0.10.0
libtpu: 0.0.40
codegen_flags: <defaults>
</compile_context>

<pallas_src>
import numpy as np
import jax
import jax.numpy as jnp
from jax import lax
from jax.experimental import pallas as pl
from jax.experimental.pallas import tpu as pltpu


def clamp_kernel(lx_ref, tm_ref, ap_ref, out_ref):
    """Whole-sequence CLAMP recurrence in a single grid step.

    lx_ref : SMEM int32[T]          scalar-prefetched curriculum
    tm_ref : VMEM f32[N+1, N]       rows 0..N-1: task similarity matrix,
                                    row N: task difficulty
    ap_ref : VMEM f32[A, 3]         columns: [efficiency, memory, boost]
    out_ref: VMEM f32[T+1, A, N]    sigmoid history, time-major layout
    """
    T = lx_ref.shape[0]
    T1, A, N = out_ref.shape

    # ---- loop-invariant values, hoisted out of the recurrence ----
    params = ap_ref[...]                                  # (A, 3)
    eff = params[:, 0:1]                                  # (A, 1)
    mem = params[:, 1:2]                                  # (A, 1)
    boost = params[:, 2:3]                                # (A, 1)
    # 2/(1+exp(-x/d)) - 1  ==  tanh(x * (0.5/d));  one divide total.
    half_inv_diff = 0.5 / tm_ref[pl.ds(N, 1), :]          # (1, N) difficulty row
    lane_ids = lax.broadcasted_iota(jnp.int32, (A, N), 1)  # prior-perf gather mask

    # t = 0 slab: sig[:, :, 0] == 0.  Single store, nothing carried.
    out_ref[0] = jnp.zeros((A, N), jnp.float32)

    zero_an = jnp.zeros((A, N), jnp.float32)

    def body(i, carry):
        result, sig = carry
        task = lx_ref[i]                                  # scalar from SMEM

        # Row lx[i] of the task matrix: dynamic sublane slice, shape (1, N).
        tm_row = tm_ref[pl.ds(task, 1), :]

        # Prior performance of each algo on the current task: sig[:, task],
        # gathered over lanes with the hoisted iota mask, shape (A, 1).
        prior_perf = jnp.sum(jnp.where(lane_ids == task, sig, 0.0),
                             axis=1, keepdims=True)

        new_result = result * mem + tm_row * (eff + prior_perf * boost)   # (A, N)
        new_sig = jnp.tanh(new_result * half_inv_diff)                    # (A, N)

        # One dense store per step straight into the VMEM output block.
        out_ref[i + 1] = new_sig
        return new_result, new_sig

    # Carry is only 2 small vregs -> no spill risk; unroll aggressively so the
    # scheduler can overlap step i's EUP tanh with step i+1's SMEM read / slice.
    unroll = True if T <= 128 else 8
    lax.fori_loop(0, T, body, (zero_an, zero_an), unroll=unroll)


def clamp_forward(lx, task_matrix, task_difficulty,
                  alg_efficiency, alg_memory, alg_experience_boost):
    """Pallas implementation of CLAMP.forward(lx). Returns (A, N, T+1) f32."""
    lx = jnp.asarray(lx, jnp.int32)
    T = int(lx.shape[0])
    N = int(task_matrix.shape[0])
    A = int(alg_efficiency.shape[0])

    f32 = jnp.float32
    # Consolidate the five tiny parameter DMAs into two.
    tm_ext = jnp.concatenate(
        [jnp.asarray(task_matrix, f32),
         jnp.asarray(task_difficulty, f32).reshape(1, N)], axis=0)   # (N+1, N)
    algo_params = jnp.stack(
        [jnp.asarray(alg_efficiency, f32),
         jnp.asarray(alg_memory, f32),
         jnp.asarray(alg_experience_boost, f32)], axis=1)            # (A, 3)

    out_t_major = pl.pallas_call(
        clamp_kernel,
        out_shape=jax.ShapeDtypeStruct((T + 1, A, N), f32),
        grid_spec=pltpu.PrefetchScalarGridSpec(
            num_scalar_prefetch=1,
            grid=(1,),                                    # single step: loop is in-kernel
            in_specs=[
                pl.BlockSpec((N + 1, N), lambda i, lx: (0, 0)),   # tm + difficulty row
                pl.BlockSpec((A, 3), lambda i, lx: (0, 0)),       # [eff | mem | boost]
            ],
            out_specs=pl.BlockSpec((T + 1, A, N), lambda i, lx: (0, 0, 0)),
        ),
        compiler_params=pltpu.CompilerParams(
            dimension_semantics=("arbitrary",)),
    )(lx, tm_ext, algo_params)

    # Tiny (~1 KB) layout fix-up back to the PyTorch (A, N, T+1) convention.
    return jnp.transpose(out_t_major, (1, 2, 0))


def clamp_reference(lx, task_matrix, task_difficulty, eff, mem, boost):
    """Pure numpy port of CLAMP.performance (for correctness check)."""
    A = eff.shape[0]
    N = task_matrix.shape[0]
    T = len(lx)
    result = np.zeros((A, N, T + 1), np.float64)
    sig = np.zeros((A, N, T + 1), np.float64)
    for a in range(A):
        for i, task in enumerate(lx):
            for t2 in range(N):
                prior_exp = result[a, t2, i] * mem[a]
                prior_perf = sig[a, task, i]
                result[a, t2, i + 1] = (prior_exp
                                        + task_matrix[task, t2] * eff[a]
                                        + task_matrix[task, t2] * prior_perf * boost[a])
                difficulty = task_difficulty[t2]
                sig[a, t2, i + 1] = 1.0 / (1.0 + np.exp(-result[a, t2, i + 1] / difficulty)) * 2 - 1
    return sig


if __name__ == "__main__":
    nalgos, ntasks, seqlen = 4, 8, 8

    # Deterministic synthetic parameters (shapes match CLAMP.__init__).
    key = jax.random.PRNGKey(0)
    k_tm, k_diff, k_eff, k_mem, k_boost, k_lx = jax.random.split(key, 6)
    task_matrix = jax.random.uniform(k_tm, (ntasks, ntasks)) * 2.0 - 1.0
    task_difficulty = jax.random.uniform(k_diff, (ntasks,)) * 0.9 + 0.1  # keep away from 0
    alg_efficiency = 0.5 + 0.02 * jax.random.normal(k_eff, (nalgos,))
    alg_memory = 0.5 + 0.10 * jax.random.normal(k_mem, (nalgos,))
    alg_boost = 0.5 + 0.02 * jax.random.normal(k_boost, (nalgos,))
    lx = jax.random.randint(k_lx, (seqlen,), 0, ntasks, dtype=jnp.int32)

    out = clamp_forward(lx, task_matrix, task_difficulty,
                        alg_efficiency, alg_memory, alg_boost)
    out = jax.block_until_ready(out)

    ref = clamp_reference(np.asarray(lx), np.asarray(task_matrix, np.float64),
                          np.asarray(task_difficulty, np.float64),
                          np.asarray(alg_efficiency, np.float64),
                          np.asarray(alg_memory, np.float64),
                          np.asarray(alg_boost, np.float64))

    assert out.shape == (nalgos, ntasks, seqlen + 1)
    np.testing.assert_allclose(np.asarray(out), ref, rtol=1e-4, atol=1e-5)
    print("KERNEL_OK")
</pallas_src>

<mosaic_0001>
module attributes {stable_mosaic.version = 11 : i64} {
  func.func @clamp_kernel(%arg0: i32, %arg1: memref<8xi32, #tpu.memory_space<smem>>, %arg2: memref<9x8xf32, #tpu.memory_space<vmem>>, %arg3: memref<4x3xf32, #tpu.memory_space<vmem>>, %arg4: memref<9x4x8xf32, #tpu.memory_space<vmem>>) attributes {dimension_semantics = [#tpu.dimension_semantics<arbitrary>], iteration_bounds = array<i64: 1>, scalar_prefetch = 1 : i64, scratch_operands = 0 : i64, tpu.core_type = #tpu.core_type<tc>, window_params = [{pipeline_mode = #tpu.pipeline_mode<synchronous>, transform_indices = @transform_0, window_bounds = array<i64: 9, 8>}, {pipeline_mode = #tpu.pipeline_mode<synchronous>, transform_indices = @transform_1, window_bounds = array<i64: 4, 3>}, {pipeline_mode = #tpu.pipeline_mode<synchronous>, transform_indices = @transform_2, window_bounds = array<i64: 9, 4, 8>}]} {
    %c0 = arith.constant 0 : index
    %c0_0 = arith.constant 0 : index
    %0 = vector.load %arg3[%c0, %c0_0] : memref<4x3xf32, #tpu.memory_space<vmem>>, vector<4x3xf32>
    %1 = vector.extract_strided_slice %0 {offsets = [0, 0], sizes = [4, 1], strides = [1, 1]} : vector<4x3xf32> to vector<4x1xf32>
    %2 = vector.extract_strided_slice %0 {offsets = [0, 1], sizes = [4, 1], strides = [1, 1]} : vector<4x3xf32> to vector<4x1xf32>
    %3 = vector.extract_strided_slice %0 {offsets = [0, 2], sizes = [4, 1], strides = [1, 1]} : vector<4x3xf32> to vector<4x1xf32>
    %c8 = arith.constant 8 : index
    %c0_1 = arith.constant 0 : index
    %4 = vector.load %arg2[%c8, %c0_1] : memref<9x8xf32, #tpu.memory_space<vmem>>, vector<1x8xf32>
    %cst = arith.constant 5.000000e-01 : f32
    %5 = vector.broadcast %cst : f32 to vector<1x8xf32>
    %6 = arith.divf %5, %4 : vector<1x8xf32>
    %7 = tpu.iota {dimensions = array<i32: 1>} : vector<4x8xi32>
    %cst_2 = arith.constant 0.000000e+00 : f32
    %8 = vector.broadcast %cst_2 : f32 to vector<4x8xf32>
    %c0_3 = arith.constant 0 : index
    %c0_4 = arith.constant 0 : index
    %c0_5 = arith.constant 0 : index
    %9 = vector.load %arg4[%c0_3, %c0_4, %c0_5] : memref<9x4x8xf32, #tpu.memory_space<vmem>>, vector<1x4x8xf32>
    %10 = vector.shape_cast %9 : vector<1x4x8xf32> to vector<4x8xf32>
    %11 = vector.shape_cast %8 : vector<4x8xf32> to vector<1x4x8xf32>
    tpu.vector_store %arg4[%c0_3, %c0_4, %c0_5], %11 {strides = array<i32>} : memref<9x4x8xf32, #tpu.memory_space<vmem>>, vector<1x4x8xf32>,
    %cst_6 = arith.constant 0.000000e+00 : f32
    %12 = vector.broadcast %cst_6 : f32 to vector<4x8xf32>
    %c0_i32 = arith.constant 0 : i32
    %13 = arith.index_cast %c0_i32 : i32 to index
    %14 = memref.load %arg1[%13] : memref<8xi32, #tpu.memory_space<smem>>
    %15 = arith.index_cast %14 : i32 to index
    %c0_7 = arith.constant 0 : index
    %16 = vector.load %arg2[%15, %c0_7] : memref<9x8xf32, #tpu.memory_space<vmem>>, vector<1x8xf32>
    %17 = vector.broadcast %14 : i32 to vector<4x8xi32>
    %18 = arith.cmpi eq, %7, %17 : vector<4x8xi32>
    %cst_8 = arith.constant 0.000000e+00 : f32
    %19 = vector.broadcast %cst_8 : f32 to vector<4x8xf32>
    %20 = arith.select %18, %12, %19 : vector<4x8xi1>, vector<4x8xf32>
    %cst_9 = arith.constant dense<0.000000e+00> : vector<4xf32>
    %21 = vector.multi_reduction <add>, %20, %cst_9 [1] : vector<4x8xf32> to vector<4xf32>
    %22 = vector.shape_cast %21 : vector<4xf32> to vector<4x1xf32>
    %23 = vector.broadcast %2 : vector<4x1xf32> to vector<4x8xf32>
    %24 = arith.mulf %12, %23 : vector<4x8xf32>
    %25 = arith.mulf %22, %3 : vector<4x1xf32>
    %26 = arith.addf %1, %25 : vector<4x1xf32>
    %27 = vector.broadcast %16 : vector<1x8xf32> to vector<4x8xf32>
    %28 = vector.broadcast %26 : vector<4x1xf32> to vector<4x8xf32>
    %29 = arith.mulf %27, %28 : vector<4x8xf32>
    %30 = arith.addf %24, %29 : vector<4x8xf32>
    %31 = vector.broadcast %6 : vector<1x8xf32> to vector<4x8xf32>
    %32 = arith.mulf %30, %31 : vector<4x8xf32>
    %33 = math.tanh %32 : vector<4x8xf32>
    %c1_i32 = arith.constant 1 : i32
    %34 = arith.addi %c0_i32, %c1_i32 : i32
    %35 = arith.index_cast %34 : i32 to index
    %c0_10 = arith.constant 0 : index
    %c0_11 = arith.constant 0 : index
    %36 = vector.load %arg4[%35, %c0_10, %c0_11] : memref<9x4x8xf32, #tpu.memory_space<vmem>>, vector<1x4x8xf32>
    %37 = vector.shape_cast %36 : vector<1x4x8xf32> to vector<4x8xf32>
    %38 = vector.shape_cast %33 : vector<4x8xf32> to vector<1x4x8xf32>
    tpu.vector_store %arg4[%35, %c0_10, %c0_11], %38 {strides = array<i32>} : memref<9x4x8xf32, #tpu.memory_space<vmem>>, vector<1x4x8xf32>,
    %c1_i32_12 = arith.constant 1 : i32
    %39 = arith.index_cast %c1_i32_12 : i32 to index
    %40 = memref.load %arg1[%39] : memref<8xi32, #tpu.memory_space<smem>>
    %41 = arith.index_cast %40 : i32 to index
    %c0_13 = arith.constant 0 : index
    %42 = vector.load %arg2[%41, %c0_13] : memref<9x8xf32, #tpu.memory_space<vmem>>, vector<1x8xf32>
    %43 = vector.broadcast %40 : i32 to vector<4x8xi32>
    %44 = arith.cmpi eq, %7, %43 : vector<4x8xi32>
    %cst_14 = arith.constant 0.000000e+00 : f32
    %45 = vector.broadcast %cst_14 : f32 to vector<4x8xf32>
    %46 = arith.select %44, %33, %45 : vector<4x8xi1>, vector<4x8xf32>
    %cst_15 = arith.constant dense<0.000000e+00> : vector<4xf32>
    %47 = vector.multi_reduction <add>, %46, %cst_15 [1] : vector<4x8xf32> to vector<4xf32>
    %48 = vector.shape_cast %47 : vector<4xf32> to vector<4x1xf32>
    %49 = vector.broadcast %2 : vector<4x1xf32> to vector<4x8xf32>
    %50 = arith.mulf %30, %49 : vector<4x8xf32>
    %51 = arith.mulf %48, %3 : vector<4x1xf32>
    %52 = arith.addf %1, %51 : vector<4x1xf32>
    %53 = vector.broadcast %42 : vector<1x8xf32> to vector<4x8xf32>
    %54 = vector.broadcast %52 : vector<4x1xf32> to vector<4x8xf32>
    %55 = arith.mulf %53, %54 : vector<4x8xf32>
    %56 = arith.addf %50, %55 : vector<4x8xf32>
    %57 = vector.broadcast %6 : vector<1x8xf32> to vector<4x8xf32>
    %58 = arith.mulf %56, %57 : vector<4x8xf32>
    %59 = math.tanh %58 : vector<4x8xf32>
    %c1_i32_16 = arith.constant 1 : i32
    %60 = arith.addi %c1_i32_12, %c1_i32_16 : i32
    %61 = arith.index_cast %60 : i32 to index
    %c0_17 = arith.constant 0 : index
    %c0_18 = arith.constant 0 : index
    %62 = vector.load %arg4[%61, %c0_17, %c0_18] : memref<9x4x8xf32, #tpu.memory_space<vmem>>, vector<1x4x8xf32>
    %63 = vector.shape_cast %62 : vector<1x4x8xf32> to vector<4x8xf32>
    %64 = vector.shape_cast %59 : vector<4x8xf32> to vector<1x4x8xf32>
    tpu.vector_store %arg4[%61, %c0_17, %c0_18], %64 {strides = array<i32>} : memref<9x4x8xf32, #tpu.memory_space<vmem>>, vector<1x4x8xf32>,
    %c2_i32 = arith.constant 2 : i32
    %65 = arith.index_cast %c2_i32 : i32 to index
    %66 = memref.load %arg1[%65] : memref<8xi32, #tpu.memory_space<smem>>
    %67 = arith.index_cast %66 : i32 to index
    %c0_19 = arith.constant 0 : index
    %68 = vector.load %arg2[%67, %c0_19] : memref<9x8xf32, #tpu.memory_space<vmem>>, vector<1x8xf32>
    %69 = vector.broadcast %66 : i32 to vector<4x8xi32>
    %70 = arith.cmpi eq, %7, %69 : vector<4x8xi32>
    %cst_20 = arith.constant 0.000000e+00 : f32
    %71 = vector.broadcast %cst_20 : f32 to vector<4x8xf32>
    %72 = arith.select %70, %59, %71 : vector<4x8xi1>, vector<4x8xf32>
    %cst_21 = arith.constant dense<0.000000e+00> : vector<4xf32>
    %73 = vector.multi_reduction <add>, %72, %cst_21 [1] : vector<4x8xf32> to vector<4xf32>
    %74 = vector.shape_cast %73 : vector<4xf32> to vector<4x1xf32>
    %75 = vector.broadcast %2 : vector<4x1xf32> to vector<4x8xf32>
    %76 = arith.mulf %56, %75 : vector<4x8xf32>
    %77 = arith.mulf %74, %3 : vector<4x1xf32>
    %78 = arith.addf %1, %77 : vector<4x1xf32>
    %79 = vector.broadcast %68 : vector<1x8xf32> to vector<4x8xf32>
    %80 = vector.broadcast %78 : vector<4x1xf32> to vector<4x8xf32>
    %81 = arith.mulf %79, %80 : vector<4x8xf32>
    %82 = arith.addf %76, %81 : vector<4x8xf32>
    %83 = vector.broadcast %6 : vector<1x8xf32> to vector<4x8xf32>
    %84 = arith.mulf %82, %83 : vector<4x8xf32>
    %85 = math.tanh %84 : vector<4x8xf32>
    %c1_i32_22 = arith.constant 1 : i32
    %86 = arith.addi %c2_i32, %c1_i32_22 : i32
    %87 = arith.index_cast %86 : i32 to index
    %c0_23 = arith.constant 0 : index
    %c0_24 = arith.constant 0 : index
    %88 = vector.load %arg4[%87, %c0_23, %c0_24] : memref<9x4x8xf32, #tpu.memory_space<vmem>>, vector<1x4x8xf32>
    %89 = vector.shape_cast %88 : vector<1x4x8xf32> to vector<4x8xf32>
    %90 = vector.shape_cast %85 : vector<4x8xf32> to vector<1x4x8xf32>
    tpu.vector_store %arg4[%87, %c0_23, %c0_24], %90 {strides = array<i32>} : memref<9x4x8xf32, #tpu.memory_space<vmem>>, vector<1x4x8xf32>,
    %c3_i32 = arith.constant 3 : i32
    %91 = arith.index_cast %c3_i32 : i32 to index
    %92 = memref.load %arg1[%91] : memref<8xi32, #tpu.memory_space<smem>>
    %93 = arith.index_cast %92 : i32 to index
    %c0_25 = arith.constant 0 : index
    %94 = vector.load %arg2[%93, %c0_25] : memref<9x8xf32, #tpu.memory_space<vmem>>, vector<1x8xf32>
    %95 = vector.broadcast %92 : i32 to vector<4x8xi32>
    %96 = arith.cmpi eq, %7, %95 : vector<4x8xi32>
    %cst_26 = arith.constant 0.000000e+00 : f32
    %97 = vector.broadcast %cst_26 : f32 to vector<4x8xf32>
    %98 = arith.select %96, %85, %97 : vector<4x8xi1>, vector<4x8xf32>
    %cst_27 = arith.constant dense<0.000000e+00> : vector<4xf32>
    %99 = vector.multi_reduction <add>, %98, %cst_27 [1] : vector<4x8xf32> to vector<4xf32>
    %100 = vector.shape_cast %99 : vector<4xf32> to vector<4x1xf32>
    %101 = vector.broadcast %2 : vector<4x1xf32> to vector<4x8xf32>
    %102 = arith.mulf %82, %101 : vector<4x8xf32>
    %103 = arith.mulf %100, %3 : vector<4x1xf32>
    %104 = arith.addf %1, %103 : vector<4x1xf32>
    %105 = vector.broadcast %94 : vector<1x8xf32> to vector<4x8xf32>
    %106 = vector.broadcast %104 : vector<4x1xf32> to vector<4x8xf32>
    %107 = arith.mulf %105, %106 : vector<4x8xf32>
    %108 = arith.addf %102, %107 : vector<4x8xf32>
    %109 = vector.broadcast %6 : vector<1x8xf32> to vector<4x8xf32>
    %110 = arith.mulf %108, %109 : vector<4x8xf32>
    %111 = math.tanh %110 : vector<4x8xf32>
    %c1_i32_28 = arith.constant 1 : i32
    %112 = arith.addi %c3_i32, %c1_i32_28 : i32
    %113 = arith.index_cast %112 : i32 to index
    %c0_29 = arith.constant 0 : index
    %c0_30 = arith.constant 0 : index
    %114 = vector.load %arg4[%113, %c0_29, %c0_30] : memref<9x4x8xf32, #tpu.memory_space<vmem>>, vector<1x4x8xf32>
    %115 = vector.shape_cast %114 : vector<1x4x8xf32> to vector<4x8xf32>
    %116 = vector.shape_cast %111 : vector<4x8xf32> to vector<1x4x8xf32>
    tpu.vector_store %arg4[%113, %c0_29, %c0_30], %116 {strides = array<i32>} : memref<9x4x8xf32, #tpu.memory_space<vmem>>, vector<1x4x8xf32>,
    %c4_i32 = arith.constant 4 : i32
    %117 = arith.index_cast %c4_i32 : i32 to index
    %118 = memref.load %arg1[%117] : memref<8xi32, #tpu.memory_space<smem>>
    %119 = arith.index_cast %118 : i32 to index
    %c0_31 = arith.constant 0 : index
    %120 = vector.load %arg2[%119, %c0_31] : memref<9x8xf32, #tpu.memory_space<vmem>>, vector<1x8xf32>
    %121 = vector.broadcast %118 : i32 to vector<4x8xi32>
    %122 = arith.cmpi eq, %7, %121 : vector<4x8xi32>
    %cst_32 = arith.constant 0.000000e+00 : f32
    %123 = vector.broadcast %cst_32 : f32 to vector<4x8xf32>
    %124 = arith.select %122, %111, %123 : vector<4x8xi1>, vector<4x8xf32>
    %cst_33 = arith.constant dense<0.000000e+00> : vector<4xf32>
    %125 = vector.multi_reduction <add>, %124, %cst_33 [1] : vector<4x8xf32> to vector<4xf32>
    %126 = vector.shape_cast %125 : vector<4xf32> to vector<4x1xf32>
    %127 = vector.broadcast %2 : vector<4x1xf32> to vector<4x8xf32>
    %128 = arith.mulf %108, %127 : vector<4x8xf32>
    %129 = arith.mulf %126, %3 : vector<4x1xf32>
    %130 = arith.addf %1, %129 : vector<4x1xf32>
    %131 = vector.broadcast %120 : vector<1x8xf32> to vector<4x8xf32>
    %132 = vector.broadcast %130 : vector<4x1xf32> to vector<4x8xf32>
    %133 = arith.mulf %131, %132 : vector<4x8xf32>
    %134 = arith.addf %128, %133 : vector<4x8xf32>
    %135 = vector.broadcast %6 : vector<1x8xf32> to vector<4x8xf32>
    %136 = arith.mulf %134, %135 : vector<4x8xf32>
    %137 = math.tanh %136 : vector<4x8xf32>
    %c1_i32_34 = arith.constant 1 : i32
    %138 = arith.addi %c4_i32, %c1_i32_34 : i32
    %139 = arith.index_cast %138 : i32 to index
    %c0_35 = arith.constant 0 : index
    %c0_36 = arith.constant 0 : index
    %140 = vector.load %arg4[%139, %c0_35, %c0_36] : memref<9x4x8xf32, #tpu.memory_space<vmem>>, vector<1x4x8xf32>
    %141 = vector.shape_cast %140 : vector<1x4x8xf32> to vector<4x8xf32>
    %142 = vector.shape_cast %137 : vector<4x8xf32> to vector<1x4x8xf32>
    tpu.vector_store %arg4[%139, %c0_35, %c0_36], %142 {strides = array<i32>} : memref<9x4x8xf32, #tpu.memory_space<vmem>>, vector<1x4x8xf32>,
    %c5_i32 = arith.constant 5 : i32
    %143 = arith.index_cast %c5_i32 : i32 to index
    %144 = memref.load %arg1[%143] : memref<8xi32, #tpu.memory_space<smem>>
    %145 = arith.index_cast %144 : i32 to index
    %c0_37 = arith.constant 0 : index
    %146 = vector.load %arg2[%145, %c0_37] : memref<9x8xf32, #tpu.memory_space<vmem>>, vector<1x8xf32>
    %147 = vector.broadcast %144 : i32 to vector<4x8xi32>
    %148 = arith.cmpi eq, %7, %147 : vector<4x8xi32>
    %cst_38 = arith.constant 0.000000e+00 : f32
    %149 = vector.broadcast %cst_38 : f32 to vector<4x8xf32>
    %150 = arith.select %148, %137, %149 : vector<4x8xi1>, vector<4x8xf32>
    %cst_39 = arith.constant dense<0.000000e+00> : vector<4xf32>
    %151 = vector.multi_reduction <add>, %150, %cst_39 [1] : vector<4x8xf32> to vector<4xf32>
    %152 = vector.shape_cast %151 : vector<4xf32> to vector<4x1xf32>
    %153 = vector.broadcast %2 : vector<4x1xf32> to vector<4x8xf32>
    %154 = arith.mulf %134, %153 : vector<4x8xf32>
    %155 = arith.mulf %152, %3 : vector<4x1xf32>
    %156 = arith.addf %1, %155 : vector<4x1xf32>
    %157 = vector.broadcast %146 : vector<1x8xf32> to vector<4x8xf32>
    %158 = vector.broadcast %156 : vector<4x1xf32> to vector<4x8xf32>
    %159 = arith.mulf %157, %158 : vector<4x8xf32>
    %160 = arith.addf %154, %159 : vector<4x8xf32>
    %161 = vector.broadcast %6 : vector<1x8xf32> to vector<4x8xf32>
    %162 = arith.mulf %160, %161 : vector<4x8xf32>
    %163 = math.tanh %162 : vector<4x8xf32>
    %c1_i32_40 = arith.constant 1 : i32
    %164 = arith.addi %c5_i32, %c1_i32_40 : i32
    %165 = arith.index_cast %164 : i32 to index
    %c0_41 = arith.constant 0 : index
    %c0_42 = arith.constant 0 : index
    %166 = vector.load %arg4[%165, %c0_41, %c0_42] : memref<9x4x8xf32, #tpu.memory_space<vmem>>, vector<1x4x8xf32>
    %167 = vector.shape_cast %166 : vector<1x4x8xf32> to vector<4x8xf32>
    %168 = vector.shape_cast %163 : vector<4x8xf32> to vector<1x4x8xf32>
    tpu.vector_store %arg4[%165, %c0_41, %c0_42], %168 {strides = array<i32>} : memref<9x4x8xf32, #tpu.memory_space<vmem>>, vector<1x4x8xf32>,
    %c6_i32 = arith.constant 6 : i32
    %169 = arith.index_cast %c6_i32 : i32 to index
    %170 = memref.load %arg1[%169] : memref<8xi32, #tpu.memory_space<smem>>
    %171 = arith.index_cast %170 : i32 to index
    %c0_43 = arith.constant 0 : index
    %172 = vector.load %arg2[%171, %c0_43] : memref<9x8xf32, #tpu.memory_space<vmem>>, vector<1x8xf32>
    %173 = vector.broadcast %170 : i32 to vector<4x8xi32>
    %174 = arith.cmpi eq, %7, %173 : vector<4x8xi32>
    %cst_44 = arith.constant 0.000000e+00 : f32
    %175 = vector.broadcast %cst_44 : f32 to vector<4x8xf32>
    %176 = arith.select %174, %163, %175 : vector<4x8xi1>, vector<4x8xf32>
    %cst_45 = arith.constant dense<0.000000e+00> : vector<4xf32>
    %177 = vector.multi_reduction <add>, %176, %cst_45 [1] : vector<4x8xf32> to vector<4xf32>
    %178 = vector.shape_cast %177 : vector<4xf32> to vector<4x1xf32>
    %179 = vector.broadcast %2 : vector<4x1xf32> to vector<4x8xf32>
    %180 = arith.mulf %160, %179 : vector<4x8xf32>
    %181 = arith.mulf %178, %3 : vector<4x1xf32>
    %182 = arith.addf %1, %181 : vector<4x1xf32>
    %183 = vector.broadcast %172 : vector<1x8xf32> to vector<4x8xf32>
    %184 = vector.broadcast %182 : vector<4x1xf32> to vector<4x8xf32>
    %185 = arith.mulf %183, %184 : vector<4x8xf32>
    %186 = arith.addf %180, %185 : vector<4x8xf32>
    %187 = vector.broadcast %6 : vector<1x8xf32> to vector<4x8xf32>
    %188 = arith.mulf %186, %187 : vector<4x8xf32>
    %189 = math.tanh %188 : vector<4x8xf32>
    %c1_i32_46 = arith.constant 1 : i32
    %190 = arith.addi %c6_i32, %c1_i32_46 : i32
    %191 = arith.index_cast %190 : i32 to index
    %c0_47 = arith.constant 0 : index
    %c0_48 = arith.constant 0 : index
    %192 = vector.load %arg4[%191, %c0_47, %c0_48] : memref<9x4x8xf32, #tpu.memory_space<vmem>>, vector<1x4x8xf32>
    %193 = vector.shape_cast %192 : vector<1x4x8xf32> to vector<4x8xf32>
    %194 = vector.shape_cast %189 : vector<4x8xf32> to vector<1x4x8xf32>
    tpu.vector_store %arg4[%191, %c0_47, %c0_48], %194 {strides = array<i32>} : memref<9x4x8xf32, #tpu.memory_space<vmem>>, vector<1x4x8xf32>,
    %c7_i32 = arith.constant 7 : i32
    %195 = arith.index_cast %c7_i32 : i32 to index
    %196 = memref.load %arg1[%195] : memref<8xi32, #tpu.memory_space<smem>>
    %197 = arith.index_cast %196 : i32 to index
    %c0_49 = arith.constant 0 : index
    %198 = vector.load %arg2[%197, %c0_49] : memref<9x8xf32, #tpu.memory_space<vmem>>, vector<1x8xf32>
    %199 = vector.broadcast %196 : i32 to vector<4x8xi32>
    %200 = arith.cmpi eq, %7, %199 : vector<4x8xi32>
    %cst_50 = arith.constant 0.000000e+00 : f32
    %201 = vector.broadcast %cst_50 : f32 to vector<4x8xf32>
    %202 = arith.select %200, %189, %201 : vector<4x8xi1>, vector<4x8xf32>
    %cst_51 = arith.constant dense<0.000000e+00> : vector<4xf32>
    %203 = vector.multi_reduction <add>, %202, %cst_51 [1] : vector<4x8xf32> to vector<4xf32>
    %204 = vector.shape_cast %203 : vector<4xf32> to vector<4x1xf32>
    %205 = vector.broadcast %2 : vector<4x1xf32> to vector<4x8xf32>
    %206 = arith.mulf %186, %205 : vector<4x8xf32>
    %207 = arith.mulf %204, %3 : vector<4x1xf32>
    %208 = arith.addf %1, %207 : vector<4x1xf32>
    %209 = vector.broadcast %198 : vector<1x8xf32> to vector<4x8xf32>
    %210 = vector.broadcast %208 : vector<4x1xf32> to vector<4x8xf32>
    %211 = arith.mulf %209, %210 : vector<4x8xf32>
    %212 = arith.addf %206, %211 : vector<4x8xf32>
    %213 = vector.broadcast %6 : vector<1x8xf32> to vector<4x8xf32>
    %214 = arith.mulf %212, %213 : vector<4x8xf32>
    %215 = math.tanh %214 : vector<4x8xf32>
    %c1_i32_52 = arith.constant 1 : i32
    %216 = arith.addi %c7_i32, %c1_i32_52 : i32
    %217 = arith.index_cast %216 : i32 to index
    %c0_53 = arith.constant 0 : index
    %c0_54 = arith.constant 0 : index
    %218 = vector.load %arg4[%217, %c0_53, %c0_54] : memref<9x4x8xf32, #tpu.memory_space<vmem>>, vector<1x4x8xf32>
    %219 = vector.shape_cast %218 : vector<1x4x8xf32> to vector<4x8xf32>
    %220 = vector.shape_cast %215 : vector<4x8xf32> to vector<1x4x8xf32>
    tpu.vector_store %arg4[%217, %c0_53, %c0_54], %220 {strides = array<i32>} : memref<9x4x8xf32, #tpu.memory_space<vmem>>, vector<1x4x8xf32>,
    %c8_i32 = arith.constant 8 : i32
    return
  }
  func.func @transform_0(%arg0: i32, %arg1: memref<8xi32, #tpu.memory_space<smem>>) -> (i32, i32) {
    %c0_i32 = arith.constant 0 : i32
    %c0_i32_0 = arith.constant 0 : i32
    %c0_i32_1 = arith.constant 0 : i32
    return %c0_i32, %c0_i32_0 : i32, i32
  }
  func.func @transform_1(%arg0: i32, %arg1: memref<8xi32, #tpu.memory_space<smem>>) -> (i32, i32) {
    %c0_i32 = arith.constant 0 : i32
    %c0_i32_0 = arith.constant 0 : i32
    %c0_i32_1 = arith.constant 0 : i32
    return %c0_i32, %c0_i32_0 : i32, i32
  }
  func.func @transform_2(%arg0: i32, %arg1: memref<8xi32, #tpu.memory_space<smem>>) -> (i32, i32, i32) {
    %c0_i32 = arith.constant 0 : i32
    %c0_i32_0 = arith.constant 0 : i32
    %c0_i32_1 = arith.constant 0 : i32
    %c0_i32_2 = arith.constant 0 : i32
    return %c0_i32, %c0_i32_0, %c0_i32_1 : i32, i32, i32
  }
}

</mosaic_0001>

<bundles_post_ra>
// kernel: tpu_custom_call.1
= control target key start
LH: loop header
LB: loop body
LE: loop exit
PB: predicated region body
PF: predicated region fallthrough
CT: control target
= control target key end

     0   :  { %s343_s15 = smov [#allocation3]   ;;  %s503_s0 = inlined_call_operand.vmem [shape: s32[8], index: 0, kind: input, shape index: {}]   ;;  %s504_s1 = inlined_call_operand.vmem [shape: f32[9,8], index: 1, kind: input, shape index: {}]   ;;  %s505_s2 = inlined_call_operand.vmem [shape: f32[4,3], index: 2, kind: input, shape index: {}]   ;;  %s506_s3 = inlined_call_operand.vmem [shape: f32[9,4,8], index: 3, kind: output, shape index: {}]  }
   0x1   :  { %s9_s14 = sshll.u32 %s503_s0, 4  ;;  %s10_s14 = int_to_ptr.vmem [resolvable:$true] %s9_s14 }
   0x2   :  { %12 = dma.vmem_to_smem %s10_s14, 16, %s343_s15, [#allocation2] }
   0x3   :  { %341 = dma.done.wait [#allocation2], 16 }
   0x4   :  { %342 = vsyncadd [#allocation2], 4294967280 }
   0x5   :  { %15 = sfence }
   0x6   :  { %vm39_vm0 = vcmask 60416   ;;  %v344_v0 = vmov 0.0   ;;  %v378_v1 = vld [vmem:[%s505_s2] sm:$0xf]  ;;  %v345_v2 = vmov 1   ;;  %s381_s0 = sld [smem:[#allocation3]]  ;;  %v37_v27 = vlaneseq }
   0x7   :  { %44 = vadd.xlane.f32.xlu0 %v344_v0  ;;  %40 = vst.msk [vmem:[%s506_s3] sm:$0xf] %vm39_vm0, %v344_v0  ;;  %299 = vset.pattern.permute.xlu1 %v345_v2  ;;  %s346_s23 = smov 126   ;;  %v347_v5 = vmov 0   ;;  %v21_v8 = vld [vmem:[%s504_s1 + $0x8] sm:$0x1] }
   0x8   :  { %48 = vperm.xlu1 %299, %v378_v1   ;;  %301 = vset.pattern.permute.xlu2 %v347_v5  ;;  %311 = vrcp.f32 %v21_v8  ;;  %vm27_vm1 = vweird.f32 %v21_v8  ;;  %v33_v13 = vand.u32 2147483648, %v21_v8  ;;  %v31_v15 = vand.u32 2147483647, %v21_v8  ;;  %s280_s25 = sld [smem:[#allocation3 + $0x1]] }
   0x9   :  { %302 = vset.pattern.permute.xlu0 %v347_v5  ;;  %v399_v29 = vand.u32 127, %v37_v27  ;;  %s282_s4 = sld [smem:[#allocation3 + $0x2]] }
   0xa   :  { %v34_v17 = vor.u32 1.1754944e-38, %v33_v13  ;;  %vm32_vm4 = vcmp.eq.f32.partialorder %v31_v15, 8.507059e+37  ;;  %s284_s10 = sld [smem:[#allocation3 + $0x3]] }
   0xb   :  { %s286_s16 = sld [smem:[#allocation3 + $0x4]] }
   0xc   :  { %s42_s22 = scalar_lea.vmem %s504_s1, %s381_s0  ;;  %s288_s21 = sld [smem:[#allocation3 + $0x5]] }
   0xd   :  { %v303_v21 = vld [vmem:[%s42_s22] ss:$0 sm:$0xff]  ;;  %s290_s27 = sld [smem:[#allocation3 + $0x6]] }
   0xe   :  { %v312_v9 = vpop.eup %311  ;;  %v74_v30 = vstv %s280_s25  ;;  %s72_s30 = scalar_lea.vmem %s504_s1, %s280_s25  ;;  %s292_s6 = sld [smem:[#allocation3 + $0x7]] }
   0xf   :  { %v23_v10 = vmul.f32 %v312_v9, %v21_v8  ;;  %vm28_vm2 = vweird.f32 %v312_v9  ;;  %vm75_vm5 = vcmp.eq.s32.totalorder %v399_v29, %v74_v30  ;;  %v304_v38 = vld [vmem:[%s72_s30] ss:$0 sm:$0xff]  ;;  %v102_v44 = vstv %s282_s4  ;;  %s100_s9 = scalar_lea.vmem %s504_s1, %s282_s4 }
  0x10   :  { %300 = vset.pattern.permute.xlu1 %v347_v5  ;;  %vm29_vm3 = vmor %vm27_vm1, %vm28_vm2  ;;  %vm103_vm6 = vcmp.eq.s32.totalorder %v399_v29, %v102_v44  ;;  %v305_v52 = vld [vmem:[%s100_s9] ss:$0 sm:$0xff]  ;;  %v130_v58 = vstv %s284_s10  ;;  %s128_s15 = scalar_lea.vmem %s504_s1, %s284_s10 }
  0x11   :  { %v24_v11 = vsub.f32 1.0, %v23_v10  ;;  %vm131_vm7 = vcmp.eq.s32.totalorder %v399_v29, %v130_v58  ;;  %s156_s20 = scalar_lea.vmem %s504_s1, %s286_s16 }
  0x12   :  { %s184_s26 = scalar_lea.vmem %s504_s1, %s288_s21 }
  0x13   :  { %v25_v12 = vmul.f32 %v312_v9, %v24_v11  ;;  %s212_s5 = scalar_lea.vmem %s504_s1, %s290_s27 }
  0x14   :  { %s240_s11 = scalar_lea.vmem %s504_s1, %s292_s6 }
  0x15   :  { %v26_v14 = vadd.f32 %v312_v9, %v25_v12 }
  0x17   :  { %v30_v18 = vsel %vm29_vm3, %v312_v9, %v26_v14  ;;  %v158_v9 = vstv %s286_s16 }
  0x18   :  { %v35_v19 = vsel %vm32_vm4, %v34_v17, %v30_v18  ;;  %vm159_vm8 = vcmp.eq.s32.totalorder %v399_v29, %v158_v9  ;;  %v307_v18 = vld [vmem:[%s156_s20] ss:$0 sm:$0xff] }
  0x19   :  { %v36_v20 = vmul.f32 0.5, %v35_v19 }
  0x1b   :  { %v396_v24 = vperm.slane %v36_v20, 0 }
  0x7a   :  { %v45_v3 = vpop.xlane.xlu0 %44  ;;  %v393_v16 = vpop.permute.xlu1 %48 }
  0x7b   :  { %v52_v4 = vmul.f32 %v45_v3, %v378_v1  ;;  %v51_v23 = vmul.f32 0.0, %v393_v16  ;;  %v306_v3 = vld [vmem:[%s128_s15] ss:$0 sm:$0xff] }
  0x7d   :  { %54 = vrot.lane.b32.xlu0 %v52_v4, %s346_s23 }
  0xef   :  { %v55_v6 = vpop.permute.xlu0 %54 }
  0xf0   :  { %v57_v7 = vadd.f32 %v55_v6, %v378_v1 }
  0xf2   :  { %61 = vperm.xlu1 %300, %v57_v7  }
 0x164   :  { %v62_v22 = vpop.permute.xlu1 %61 }
 0x165   :  { %v64_v25 = vmul.f32 %v303_v21, %v62_v22 }
 0x167   :  { %v65_v26 = vadd.f32 %v64_v25, %v51_v23  ;;  %v186_v25 = vstv %s288_s21 }
 0x168   :  { %vm187_vm9 = vcmp.eq.s32.totalorder %v399_v29, %v186_v25 }
 0x169   :  { %v67_v28 = vmul.f32 %v396_v24, %v65_v26  ;;  %v80_v40 = vmul.f32 %v65_v26, %v393_v16 }
 0x16b   :  { %313 = vtanh.f32 %v67_v28 }
 0x171   :  { %v314_v31 = vpop.eup %313 }
 0x172   :  { %279 = vst.msk [vmem:[%s506_s3 + $0x4] sm:$0xf] %vm39_vm0, %v314_v31  ;;  %v76_v32 = vsel %vm75_vm5, %v314_v31, 0.0 }
 0x173   :  { %v77_v33 = vsel %vm39_vm0, %v76_v32, 0.0 }
 0x174   :  { %78 = vadd.xlane.f32.xlu2 %v77_v33 }
 0x1e7   :  { %v79_v34 = vpop.xlane.xlu2 %78 }
 0x1e8   :  { %v81_v35 = vmul.f32 %v79_v34, %v378_v1  ;;  %v308_v34 = vld [vmem:[%s184_s26] ss:$0 sm:$0xff] }
 0x1ea   :  { %83 = vrot.lane.b32.xlu2 %v81_v35, %s346_s23 }
 0x244   :  { %v84_v36 = vpop.permute.xlu2 %83 }
 0x245   :  { %v86_v37 = vadd.f32 %v84_v36, %v378_v1 }
 0x247   :  { %90 = vperm.xlu1 %300, %v86_v37  }
 0x2b9   :  { %v91_v39 = vpop.permute.xlu1 %90 }
 0x2ba   :  { %v93_v41 = vmul.f32 %v304_v38, %v91_v39 }
 0x2bc   :  { %v94_v42 = vadd.f32 %v93_v41, %v80_v40  ;;  %v214_v40 = vstv %s290_s27 }
 0x2bd   :  { %vm215_vm10 = vcmp.eq.s32.totalorder %v399_v29, %v214_v40 }
 0x2be   :  { %v95_v43 = vmul.f32 %v94_v42, %v396_v24  ;;  %v108_v54 = vmul.f32 %v94_v42, %v393_v16 }
 0x2c0   :  { %315 = vtanh.f32 %v95_v43 }
 0x2c6   :  { %v316_v45 = vpop.eup %315 }
 0x2c7   :  { %281 = vst.msk [vmem:[%s506_s3 + $0x8] sm:$0xf] %vm39_vm0, %v316_v45  ;;  %v104_v46 = vsel %vm103_vm6, %v316_v45, 0.0 }
 0x2c8   :  { %v105_v47 = vsel %vm39_vm0, %v104_v46, 0.0 }
 0x2c9   :  { %106 = vadd.xlane.f32.xlu1 %v105_v47 }
 0x33c   :  { %v107_v48 = vpop.xlane.xlu1 %106 }
 0x33d   :  { %v109_v49 = vmul.f32 %v107_v48, %v378_v1  ;;  %v309_v48 = vld [vmem:[%s212_s5] ss:$0 sm:$0xff] }
 0x33f   :  { %111 = vrot.lane.b32.xlu0 %v109_v49, %s346_s23 }
 0x3b1   :  { %v112_v50 = vpop.permute.xlu0 %111 }
 0x3b2   :  { %v114_v51 = vadd.f32 %v112_v50, %v378_v1 }
 0x3b4   :  { %118 = vperm.xlu2 %301, %v114_v51  }
 0x40e   :  { %v119_v53 = vpop.permute.xlu2 %118 }
 0x40f   :  { %v121_v55 = vmul.f32 %v305_v52, %v119_v53 }
 0x411   :  { %v122_v56 = vadd.f32 %v121_v55, %v108_v54  ;;  %v242_v54 = vstv %s292_s6 }
 0x412   :  { %vm243_vm11 = vcmp.eq.s32.totalorder %v399_v29, %v242_v54 }
 0x413   :  { %v123_v57 = vmul.f32 %v122_v56, %v396_v24  ;;  %v136_v5 = vmul.f32 %v122_v56, %v393_v16 }
 0x415   :  { %317 = vtanh.f32 %v123_v57 }
 0x41b   :  { %v318_v59 = vpop.eup %317 }
 0x41c   :  { %283 = vst.msk [vmem:[%s506_s3 + $0xc] sm:$0xf] %vm39_vm0, %v318_v59  ;;  %v132_v60 = vsel %vm131_vm7, %v318_v59, 0.0 }
 0x41d   :  { %v133_v61 = vsel %vm39_vm0, %v132_v60, 0.0 }
 0x41e   :  { %134 = vadd.xlane.f32.xlu0 %v133_v61  ;;  %v310_v61 = vld [vmem:[%s240_s11] ss:$0 sm:$0xff] }
 0x491   :  { %v135_v62 = vpop.xlane.xlu0 %134 }
 0x492   :  { %v137_v63 = vmul.f32 %v135_v62, %v378_v1 }
 0x494   :  { %139 = vrot.lane.b32.xlu2 %v137_v63, %s346_s23 }
 0x4ee   :  { %v140_v0 = vpop.permute.xlu2 %139 }
 0x4ef   :  { %v142_v2 = vadd.f32 %v140_v0, %v378_v1 }
 0x4f1   :  { %146 = vperm.xlu2 %301, %v142_v2  }
 0x54b   :  { %v147_v4 = vpop.permute.xlu2 %146 }
 0x54c   :  { %v149_v6 = vmul.f32 %v306_v3, %v147_v4 }
 0x54e   :  { %v150_v7 = vadd.f32 %v149_v6, %v136_v5 }
 0x550   :  { %v151_v8 = vmul.f32 %v150_v7, %v396_v24  ;;  %v164_v20 = vmul.f32 %v150_v7, %v393_v16 }
 0x552   :  { %319 = vtanh.f32 %v151_v8 }
 0x558   :  { %v320_v10 = vpop.eup %319 }
 0x559   :  { %285 = vst.msk [vmem:[%s506_s3 + $0x10] sm:$0xf] %vm39_vm0, %v320_v10  ;;  %v160_v11 = vsel %vm159_vm8, %v320_v10, 0.0 }
 0x55a   :  { %v161_v12 = vsel %vm39_vm0, %v160_v11, 0.0 }
 0x55b   :  { %162 = vadd.xlane.f32.xlu2 %v161_v12 }
 0x5ce   :  { %v163_v13 = vpop.xlane.xlu2 %162 }
 0x5cf   :  { %v165_v14 = vmul.f32 %v163_v13, %v378_v1 }
 0x5d1   :  { %167 = vrot.lane.b32.xlu1 %v165_v14, %s346_s23 }
 0x643   :  { %v168_v15 = vpop.permute.xlu1 %167 }
 0x644   :  { %v170_v17 = vadd.f32 %v168_v15, %v378_v1 }
 0x646   :  { %174 = vperm.xlu0 %302, %v170_v17  }
 0x6b8   :  { %v175_v19 = vpop.permute.xlu0 %174 }
 0x6b9   :  { %v177_v21 = vmul.f32 %v307_v18, %v175_v19 }
 0x6bb   :  { %v178_v22 = vadd.f32 %v177_v21, %v164_v20 }
 0x6bd   :  { %v179_v23 = vmul.f32 %v178_v22, %v396_v24  ;;  %v192_v36 = vmul.f32 %v178_v22, %v393_v16 }
 0x6bf   :  { %321 = vtanh.f32 %v179_v23 }
 0x6c5   :  { %v322_v26 = vpop.eup %321 }
 0x6c6   :  { %287 = vst.msk [vmem:[%s506_s3 + $0x14] sm:$0xf] %vm39_vm0, %v322_v26  ;;  %v188_v27 = vsel %vm187_vm9, %v322_v26, 0.0 }
 0x6c7   :  { %v189_v28 = vsel %vm39_vm0, %v188_v27, 0.0 }
 0x6c8   :  { %190 = vadd.xlane.f32.xlu1 %v189_v28 }
 0x73b   :  { %v191_v30 = vpop.xlane.xlu1 %190 }
 0x73c   :  { %v193_v31 = vmul.f32 %v191_v30, %v378_v1 }
 0x73e   :  { %195 = vrot.lane.b32.xlu2 %v193_v31, %s346_s23 }
 0x798   :  { %v196_v32 = vpop.permute.xlu2 %195 }
 0x799   :  { %v198_v33 = vadd.f32 %v196_v32, %v378_v1 }
 0x79b   :  { %202 = vperm.xlu0 %302, %v198_v33  }
 0x80d   :  { %v203_v35 = vpop.permute.xlu0 %202 }
 0x80e   :  { %v205_v37 = vmul.f32 %v308_v34, %v203_v35 }
 0x810   :  { %v206_v38 = vadd.f32 %v205_v37, %v192_v36 }
 0x812   :  { %v207_v39 = vmul.f32 %v206_v38, %v396_v24  ;;  %v220_v50 = vmul.f32 %v206_v38, %v393_v16 }
 0x814   :  { %323 = vtanh.f32 %v207_v39 }
 0x81a   :  { %v324_v41 = vpop.eup %323 }
 0x81b   :  { %289 = vst.msk [vmem:[%s506_s3 + $0x18] sm:$0xf] %vm39_vm0, %v324_v41  ;;  %v216_v42 = vsel %vm215_vm10, %v324_v41, 0.0 }
 0x81c   :  { %v217_v43 = vsel %vm39_vm0, %v216_v42, 0.0 }
 0x81d   :  { %218 = vadd.xlane.f32.xlu2 %v217_v43 }
 0x890   :  { %v219_v44 = vpop.xlane.xlu2 %218 }
 0x891   :  { %v221_v45 = vmul.f32 %v219_v44, %v378_v1 }
 0x893   :  { %223 = vrot.lane.b32.xlu0 %v221_v45, %s346_s23 }
 0x905   :  { %v224_v46 = vpop.permute.xlu0 %223 }
 0x906   :  { %v226_v47 = vadd.f32 %v224_v46, %v378_v1 }
 0x908   :  { %230 = vperm.xlu1 %300, %v226_v47  }
 0x97a   :  { %v231_v49 = vpop.permute.xlu1 %230 }
 0x97b   :  { %v233_v51 = vmul.f32 %v309_v48, %v231_v49 }
 0x97d   :  { %v234_v52 = vadd.f32 %v233_v51, %v220_v50 }
 0x97f   :  { %v235_v53 = vmul.f32 %v234_v52, %v396_v24  ;;  %v248_v63 = vmul.f32 %v234_v52, %v393_v16 }
 0x981   :  { %325 = vtanh.f32 %v235_v53 }
 0x987   :  { %v326_v55 = vpop.eup %325 }
 0x988   :  { %291 = vst.msk [vmem:[%s506_s3 + $0x1c] sm:$0xf] %vm39_vm0, %v326_v55  ;;  %v244_v56 = vsel %vm243_vm11, %v326_v55, 0.0 }
 0x989   :  { %v245_v57 = vsel %vm39_vm0, %v244_v56, 0.0 }
 0x98a   :  { %246 = vadd.xlane.f32.xlu0 %v245_v57 }
 0x9fd   :  { %v247_v58 = vpop.xlane.xlu0 %246 }
 0x9fe   :  { %v249_v59 = vmul.f32 %v247_v58, %v378_v1 }
 0xa00   :  { %251 = vrot.lane.b32.xlu1 %v249_v59, %s346_s23 }
 0xa72   :  { %v252_v29 = vpop.permute.xlu1 %251 }
 0xa73   :  { %v254_v60 = vadd.f32 %v252_v29, %v378_v1 }
 0xa75   :  { %258 = vperm.xlu2 %301, %v254_v60  }
 0xacf   :  { %v259_v62 = vpop.permute.xlu2 %258 }
 0xad0   :  { %v261_v0 = vmul.f32 %v310_v61, %v259_v62 }
 0xad2   :  { %v262_v2 = vadd.f32 %v261_v0, %v248_v63 }
 0xad4   :  { %v263_v3 = vmul.f32 %v262_v2, %v396_v24 }
 0xad6   :  { %327 = vtanh.f32 %v263_v3 }
 0xadc   :  { %v328_v4 = vpop.eup %327 }
 0xadd   :  { %293 = vst.msk [vmem:[%s506_s3 + $0x20] sm:$0xf] %vm39_vm0, %v328_v4 }

</bundles_post_ra>
